<compile_context>
chip_gen: v7x
topology: tpu7x:2x2x1
jax: 0.10.0
libtpu: 0.0.40
codegen_flags: <defaults>
</compile_context>

<pallas_src>
import jax
import jax.numpy as jnp
from jax.experimental import pallas as pl
from jax.experimental.pallas import tpu as pltpu


def _make_kernel(*, alpha, inv_n, batch, tb, n_feat, nblocks, steps, padded,
                 use_kl, inv_nw):
    """Build the tiled kernel body.

    refs (in order):
      pred_ref : VMEM (tb, F) native dtype
      targ_ref : VMEM (tb, F) native dtype
      fcw_ref  : VMEM (L, H)  native dtype        (only present when use_kl)
      out_ref  : VMEM (1, 8, 128) float32         (per-core partial, lane-dense block)
      acc_ref  : VMEM (tb, F) float32 scratch     (resident per-core partial sums)
      aw_ref   : VMEM (tb, F) float32 scratch     (alpha-folded feature-weight plane)
    """
    w_step = 0.5 / float(max(n_feat - 1, 1))   # linspace(1, 1.5, F)[j] = 1 + w_step * j

    def kernel(*refs):
        if use_kl:
            pred_ref, targ_ref, fcw_ref, out_ref, acc_ref, aw_ref = refs
        else:
            pred_ref, targ_ref, out_ref, acc_ref, aw_ref = refs
            fcw_ref = None

        c = pl.program_id(0)       # batch split ("parallel": megacore on v7x)
        s = pl.program_id(1)       # reduction steps within this split ("arbitrary")

        @pl.when(s == 0)
        def _init():
            acc_ref[...] = jnp.zeros_like(acc_ref)
            # alpha-folded feature weights, built once per core, NOT in the hot loop:
            #   aw[:, j] = alpha * (1 + 0.5 * j / (F - 1))
            col = jax.lax.broadcasted_iota(jnp.int32, aw_ref.shape, 1).astype(jnp.float32)
            aw_ref[...] = alpha * (1.0 + w_step * col)

        # Native-dtype loads, upcast in-kernel (halves HBM traffic for bf16 inputs).
        p = pred_ref[...].astype(jnp.float32)
        t = targ_ref[...].astype(jnp.float32)

        pc = jnp.clip(p, -10.0, 10.0)
        tc = jnp.clip(t, -10.0, 10.0)
        dc = pc - tc
        d = p - t
        # fused contribution: clamped-MSE term + alpha-weighted (unclamped) term
        contrib = dc * dc + aw_ref[...] * (d * d)

        blk = c * steps + s        # logical block index over the batch

        if padded:
            # Only the boundary / overhang tiles pay for the row mask.
            @pl.when(blk >= nblocks - 1)
            def _acc_masked():
                row = jax.lax.broadcasted_iota(jnp.int32, contrib.shape, 0) + blk * tb
                acc_ref[...] += jnp.where(row < batch, contrib, 0.0)

            @pl.when(blk < nblocks - 1)
            def _acc_full():
                acc_ref[...] += contrib
        else:
            acc_ref[...] += contrib

        @pl.when(s == pl.num_programs(1) - 1)
        def _finalize():
            partial = jnp.sum(acc_ref[...]) * inv_n
            if use_kl:
                fcw = fcw_ref[...].astype(jnp.float32)
                kl = 0.3 * jnp.sum(fcw * fcw) * inv_nw
                # add the weight regulariser exactly once (split 0 only)
                partial = partial + jnp.where(c == 0, kl, 0.0)
            out_ref[...] = jnp.broadcast_to(partial, out_ref.shape)

    return kernel


def custom_vae_loss(predictions, targets, fc_var_weight=None, *, alpha=0.5,
                    beta=0.1, epoch=None, target_block_bytes=2 << 20,
                    core_splits=None, input_buffers=None):
    """Pallas forward of CustomVAELoss (base_loss='mse').

    `beta` kept for API parity (unused in forward, as in the PyTorch module).
    `epoch` must be a static Python int (or None): it selects a compile-time
    specialization (the fc_var regulariser only exists when epoch % 10 == 0).
    `input_buffers=3` can help on v5e (slowest HBM); default keeps Pallas' 2.
    """
    del beta
    assert predictions.ndim == 2 and predictions.shape == targets.shape
    assert epoch is None or isinstance(epoch, int), "epoch must be a static Python int"
    B, F = predictions.shape

    use_kl = bool(epoch) and (int(epoch) % 10 == 0)
    if use_kl:
        assert fc_var_weight is not None and fc_var_weight.ndim == 2

    # ---- tile sizing by bytes: target ~target_block_bytes per input block, rounded
    # to the dtype's native sublane multiple (8 f32 / 16 bf16 / 32 int8-fp8). ----
    in_itemsize = predictions.dtype.itemsize
    sublane = max(8, 32 // in_itemsize)
    per_row = F * in_itemsize
    if B * per_row <= target_block_bytes:
        tb = B                          # whole batch in one block (exact dim, no padding)
    else:
        tb = max(sublane, (target_block_bytes // per_row) // sublane * sublane)
    nblocks = pl.cdiv(B, tb)

    # ---- leading "parallel" axis: splits the batch across v7x's two TensorCores.
    # On 1-TC chips it is just an outer loop; auto-enable only when the overhang
    # waste (at most one duplicated tile) is negligible. ----
    if core_splits is None:
        nc = 2 if nblocks >= 8 else 1
    else:
        nc = max(1, min(int(core_splits), nblocks))
    steps = pl.cdiv(nblocks, nc)
    padded = (nc * steps * tb) != B      # tail rows and/or overhang tiles exist

    if nc * steps > nblocks:
        # Clamp overhang tiles onto the last real block (their rows are masked out),
        # keeping the auto-DMA in bounds.
        def data_idx(c, s):
            return (jnp.minimum(c * steps + s, nblocks - 1), 0)
    else:
        def data_idx(c, s):
            return (c * steps + s, 0)

    inv_n = 1.0 / float(B * F)
    inv_nw = 1.0 / float(fc_var_weight.size) if use_kl else 0.0

    kernel = _make_kernel(alpha=float(alpha), inv_n=inv_n, batch=B, tb=tb,
                          n_feat=F, nblocks=nblocks, steps=steps, padded=padded,
                          use_kl=use_kl, inv_nw=inv_nw)

    if input_buffers is None:
        data_spec = pl.BlockSpec((tb, F), data_idx)
    else:
        data_spec = pl.BlockSpec((tb, F), data_idx,
                                 pipeline_mode=pl.Buffered(int(input_buffers)))
    in_specs = [data_spec, data_spec]
    args = [predictions, targets]
    fcw_bytes = 0
    if use_kl:
        lw, lh = fc_var_weight.shape
        in_specs.append(pl.BlockSpec((lw, lh), lambda c, s: (0, 0)))  # tiny, resident
        args.append(fc_var_weight)
        fcw_bytes = 2 * fc_var_weight.size * fc_var_weight.dtype.itemsize

    # ---- explicit VMEM budget: 2 inputs x multi-buffer + 2 f32 scratch planes +
    # resident fc_var block + output block; capped at 48 MiB so the same config
    # also fits v7x's 64 MiB-per-TensorCore VMEM. ----
    nbuf = 2 if input_buffers is None else int(input_buffers)
    footprint = (2 * nbuf * tb * F * in_itemsize     # pred + targ blocks
                 + 2 * tb * F * 4                    # acc + weight-plane scratch (f32)
                 + fcw_bytes
                 + 2 * 8 * 128 * 4)                  # output block (double-buffered)
    vmem_limit = min(48 << 20, max(16 << 20, int(footprint * 1.25) + (2 << 20)))

    out = pl.pallas_call(
        kernel,
        out_shape=jax.ShapeDtypeStruct((nc, 8, 128), jnp.float32),
        grid_spec=pltpu.PrefetchScalarGridSpec(
            num_scalar_prefetch=0,
            grid=(nc, steps),
            in_specs=in_specs,
            out_specs=pl.BlockSpec((1, 8, 128), lambda c, s: (c, 0, 0)),
            scratch_shapes=[pltpu.VMEM((tb, F), jnp.float32),    # acc
                            pltpu.VMEM((tb, F), jnp.float32)],   # alpha-folded weights
        ),
        compiler_params=pltpu.CompilerParams(
            dimension_semantics=("parallel", "arbitrary"),
            vmem_limit_bytes=vmem_limit),
    )(*args)

    # Per-core partials live at [:, 0, 0]; summing them is a tiny wrapper-side op.
    return jnp.sum(out[:, 0, 0])


def _reference(predictions, targets, fc_var_weight=None, *, alpha=0.5, epoch=None):
    p = predictions.astype(jnp.float32)
    t = targets.astype(jnp.float32)
    base = jnp.mean((jnp.clip(p, -10.0, 10.0) - jnp.clip(t, -10.0, 10.0)) ** 2)
    w = jnp.linspace(1.0, 1.5, p.shape[1], dtype=jnp.float32)
    weighted = jnp.mean(w * (p - t) ** 2)
    total = base + alpha * weighted
    if epoch and epoch % 10 == 0:
        total = total + 0.3 * jnp.mean(fc_var_weight.astype(jnp.float32) ** 2)
    return total


if __name__ == "__main__":
    key = jax.random.PRNGKey(0)
    k1, k2, k3, k4, k5, k6, k7 = jax.random.split(key, 7)

    batch, features = 8, 128          # (B, F) layout
    latent, hidden = 16, 32           # fc_var: Linear(hidden -> latent)

    predictions = jax.random.normal(k1, (batch, features), jnp.float32) * 4.0
    targets = jax.random.normal(k2, (batch, features), jnp.float32) * 4.0
    fc_var_weight = jax.random.normal(k3, (latent, hidden), jnp.float32) * 0.1

    # epoch=None path (no weight regulariser), whole batch in one block
    loss = custom_vae_loss(predictions, targets, fc_var_weight,
                           alpha=0.5, beta=0.1, epoch=None)
    jax.block_until_ready(loss)
    ref = _reference(predictions, targets, fc_var_weight, alpha=0.5, epoch=None)
    assert jnp.allclose(loss, ref, rtol=1e-5, atol=1e-5), (loss, ref)

    # epoch % 10 == 0 path (adds fc_var weight regulariser)
    loss10 = custom_vae_loss(predictions, targets, fc_var_weight,
                             alpha=0.5, beta=0.1, epoch=10)
    jax.block_until_ready(loss10)
    ref10 = _reference(predictions, targets, fc_var_weight, alpha=0.5, epoch=10)
    assert jnp.allclose(loss10, ref10, rtol=1e-5, atol=1e-5), (loss10, ref10)

    # tiled + masked-tail + 2-way split path (odd block count -> clamped overhang tile)
    b2 = 20
    p2 = jax.random.normal(k4, (b2, features), jnp.float32) * 4.0
    t2 = jax.random.normal(k5, (b2, features), jnp.float32) * 4.0
    loss_t = custom_vae_loss(p2, t2, fc_var_weight, alpha=0.5, beta=0.1, epoch=None,
                             target_block_bytes=4096, core_splits=2)
    jax.block_until_ready(loss_t)
    ref_t = _reference(p2, t2, fc_var_weight, alpha=0.5, epoch=None)
    assert jnp.allclose(loss_t, ref_t, rtol=1e-5, atol=1e-5), (loss_t, ref_t)

    # evenly-split 2-way path + KL term added exactly once (split 0 only)
    b3 = 32
    p3 = jax.random.normal(k6, (b3, features), jnp.float32) * 4.0
    t3 = jax.random.normal(k7, (b3, features), jnp.float32) * 4.0
    loss_e = custom_vae_loss(p3, t3, fc_var_weight, alpha=0.5, beta=0.1, epoch=20,
                             target_block_bytes=4096, core_splits=2)
    jax.block_until_ready(loss_e)
    ref_e = _reference(p3, t3, fc_var_weight, alpha=0.5, epoch=20)
    assert jnp.allclose(loss_e, ref_e, rtol=1e-5, atol=1e-5), (loss_e, ref_e)

    print("KERNEL_OK")
</pallas_src>

<mosaic_0001>
module attributes {stable_mosaic.version = 11 : i64} {
  func.func @kernel(%arg0: i32, %arg1: i32, %arg2: memref<8x128xf32, #tpu.memory_space<vmem>>, %arg3: memref<8x128xf32, #tpu.memory_space<vmem>>, %arg4: memref<1x8x128xf32, #tpu.memory_space<vmem>>, %arg5: memref<8x128xf32, #tpu.memory_space<vmem>>, %arg6: memref<8x128xf32, #tpu.memory_space<vmem>>) attributes {dimension_semantics = [#tpu.dimension_semantics<parallel>, #tpu.dimension_semantics<arbitrary>], iteration_bounds = array<i64: 1, 1>, scalar_prefetch = 0 : i64, scratch_operands = 2 : i64, tpu.core_type = #tpu.core_type<tc>, window_params = [{transform_indices = @transform_0, window_bounds = array<i64: 8, 128>}, {transform_indices = @transform_1, window_bounds = array<i64: 8, 128>}, {transform_indices = @transform_2, window_bounds = array<i64: 1, 8, 128>}]} {
    %c0_i32 = arith.constant 0 : i32
    %0 = arith.cmpi eq, %arg1, %c0_i32 : i32
    %1 = arith.extui %0 : i1 to i32
    %c0_i32_0 = arith.constant 0 : i32
    %2 = arith.cmpi ne, %1, %c0_i32_0 : i32
    scf.if %2 {
      %cst_15 = arith.constant 0.000000e+00 : f32
      %26 = vector.broadcast %cst_15 : f32 to vector<8x128xf32>
      %c0_16 = arith.constant 0 : index
      %c0_17 = arith.constant 0 : index
      %27 = vector.load %arg5[%c0_16, %c0_17] : memref<8x128xf32, #tpu.memory_space<vmem>>, vector<8x128xf32>
      tpu.vector_store %arg5[%c0_16, %c0_17], %26 {strides = array<i32>} : memref<8x128xf32, #tpu.memory_space<vmem>>, vector<8x128xf32>,
      %28 = tpu.iota {dimensions = array<i32: 1>} : vector<8x128xi32>
      %29 = arith.sitofp %28 : vector<8x128xi32> to vector<8x128xf32>
      %cst_18 = arith.constant 0.00393700786 : f32
      %30 = vector.broadcast %cst_18 : f32 to vector<8x128xf32>
      %31 = arith.mulf %30, %29 : vector<8x128xf32>
      %cst_19 = arith.constant 1.000000e+00 : f32
      %32 = vector.broadcast %cst_19 : f32 to vector<8x128xf32>
      %33 = arith.addf %32, %31 : vector<8x128xf32>
      %cst_20 = arith.constant 5.000000e-01 : f32
      %34 = vector.broadcast %cst_20 : f32 to vector<8x128xf32>
      %35 = arith.mulf %34, %33 : vector<8x128xf32>
      %c0_21 = arith.constant 0 : index
      %c0_22 = arith.constant 0 : index
      %36 = vector.load %arg6[%c0_21, %c0_22] : memref<8x128xf32, #tpu.memory_space<vmem>>, vector<8x128xf32>
      tpu.vector_store %arg6[%c0_21, %c0_22], %35 {strides = array<i32>} : memref<8x128xf32, #tpu.memory_space<vmem>>, vector<8x128xf32>,
    } else {
    }
    %c0 = arith.constant 0 : index
    %c0_1 = arith.constant 0 : index
    %3 = vector.load %arg2[%c0, %c0_1] : memref<8x128xf32, #tpu.memory_space<vmem>>, vector<8x128xf32>
    %c0_2 = arith.constant 0 : index
    %c0_3 = arith.constant 0 : index
    %4 = vector.load %arg3[%c0_2, %c0_3] : memref<8x128xf32, #tpu.memory_space<vmem>>, vector<8x128xf32>
    %cst = arith.constant -1.000000e+01 : f32
    %cst_4 = arith.constant 1.000000e+01 : f32
    %5 = vector.broadcast %cst : f32 to vector<8x128xf32>
    %6 = arith.maximumf %5, %3 : vector<8x128xf32>
    %7 = vector.broadcast %cst_4 : f32 to vector<8x128xf32>
    %8 = arith.minimumf %7, %6 : vector<8x128xf32>
    %cst_5 = arith.constant -1.000000e+01 : f32
    %cst_6 = arith.constant 1.000000e+01 : f32
    %9 = vector.broadcast %cst_5 : f32 to vector<8x128xf32>
    %10 = arith.maximumf %9, %4 : vector<8x128xf32>
    %11 = vector.broadcast %cst_6 : f32 to vector<8x128xf32>
    %12 = arith.minimumf %11, %10 : vector<8x128xf32>
    %13 = arith.subf %8, %12 : vector<8x128xf32>
    %14 = arith.subf %3, %4 : vector<8x128xf32>
    %15 = arith.mulf %13, %13 : vector<8x128xf32>
    %c0_7 = arith.constant 0 : index
    %c0_8 = arith.constant 0 : index
    %16 = vector.load %arg6[%c0_7, %c0_8] : memref<8x128xf32, #tpu.memory_space<vmem>>, vector<8x128xf32>
    %17 = arith.mulf %14, %14 : vector<8x128xf32>
    %18 = arith.mulf %16, %17 : vector<8x128xf32>
    %19 = arith.addf %15, %18 : vector<8x128xf32>
    %c0_9 = arith.constant 0 : index
    %c0_10 = arith.constant 0 : index
    %20 = vector.load %arg5[%c0_9, %c0_10] : memref<8x128xf32, #tpu.memory_space<vmem>>, vector<8x128xf32>
    %21 = arith.addf %20, %19 : vector<8x128xf32>
    %c0_11 = arith.constant 0 : index
    %c0_12 = arith.constant 0 : index
    %22 = vector.load %arg5[%c0_11, %c0_12] : memref<8x128xf32, #tpu.memory_space<vmem>>, vector<8x128xf32>
    tpu.vector_store %arg5[%c0_11, %c0_12], %21 {strides = array<i32>} : memref<8x128xf32, #tpu.memory_space<vmem>>, vector<8x128xf32>,
    %c0_i32_13 = arith.constant 0 : i32
    %23 = arith.cmpi eq, %arg1, %c0_i32_13 : i32
    %24 = arith.extui %23 : i1 to i32
    %c0_i32_14 = arith.constant 0 : i32
    %25 = arith.cmpi ne, %24, %c0_i32_14 : i32
    scf.if %25 {
      %c0_15 = arith.constant 0 : index
      %c0_16 = arith.constant 0 : index
      %26 = vector.load %arg5[%c0_15, %c0_16] : memref<8x128xf32, #tpu.memory_space<vmem>>, vector<8x128xf32>
      %27 = vector.shape_cast %26 : vector<8x128xf32> to vector<1x8x128xf32>
      %cst_17 = arith.constant dense<0.000000e+00> : vector<1xf32>
      %28 = vector.multi_reduction <add>, %27, %cst_17 [1, 2] : vector<1x8x128xf32> to vector<1xf32>
      %29 = vector.shape_cast %28 : vector<1xf32> to vector<1x1x1xf32>
      %30 = vector.extract %29[0, 0, 0] : f32 from vector<1x1x1xf32>
      %cst_18 = arith.constant 9.765625E-4 : f32
      %31 = arith.mulf %30, %cst_18 : f32
      %32 = vector.broadcast %31 : f32 to vector<1x8x128xf32>
      %c0_19 = arith.constant 0 : index
      %c0_20 = arith.constant 0 : index
      %c0_21 = arith.constant 0 : index
      %33 = vector.load %arg4[%c0_19, %c0_20, %c0_21] : memref<1x8x128xf32, #tpu.memory_space<vmem>>, vector<1x8x128xf32>
      tpu.vector_store %arg4[%c0_19, %c0_20, %c0_21], %32 {strides = array<i32>} : memref<1x8x128xf32, #tpu.memory_space<vmem>>, vector<1x8x128xf32>,
    } else {
    }
    return
  }
  func.func @transform_0(%arg0: i32, %arg1: i32) -> (i32, i32) {
    %c1_i32 = arith.constant 1 : i32
    %0 = arith.muli %arg0, %c1_i32 : i32
    %1 = arith.addi %0, %arg1 : i32
    %c0_i32 = arith.constant 0 : i32
    %c0_i32_0 = arith.constant 0 : i32
    return %1, %c0_i32 : i32, i32
  }
  func.func @transform_1(%arg0: i32, %arg1: i32) -> (i32, i32) {
    %c1_i32 = arith.constant 1 : i32
    %0 = arith.muli %arg0, %c1_i32 : i32
    %1 = arith.addi %0, %arg1 : i32
    %c0_i32 = arith.constant 0 : i32
    %c0_i32_0 = arith.constant 0 : i32
    return %1, %c0_i32 : i32, i32
  }
  func.func @transform_2(%arg0: i32, %arg1: i32) -> (i32, i32, i32) {
    %c0_i32 = arith.constant 0 : i32
    %c0_i32_0 = arith.constant 0 : i32
    %c0_i32_1 = arith.constant 0 : i32
    return %arg0, %c0_i32, %c0_i32_0 : i32, i32, i32
  }
}

</mosaic_0001>

<bundles_post_ra>
// kernel: tpu_custom_call.1
= control target key start
LH: loop header
LB: loop body
LE: loop exit
PB: predicated region body
PF: predicated region fallthrough
CT: control target
= control target key end

     0   :  { %7 = vsyncpa [#allocation5], 0  ;;  %s237_s0 = inlined_call_operand.hbm [shape: f32[8,128], index: 0, kind: input, shape index: {}]   ;;  %s238_s1 = inlined_call_operand.hbm [shape: f32[8,128], index: 1, kind: input, shape index: {}]   ;;  %s239_s2 = inlined_call_operand.hbm [shape: f32[1,8,128], index: 2, kind: output, shape index: {}]  }
   0x1   :  { %8 = vsyncpa [#allocation8], 0 }
   0x2   :  { %9 = vsyncpa [#allocation6], 0  ;;  %s183_s9 = smov [#allocation4]   ;;  %s184_s11 = smov [#allocation7]  }
   0x3   :  { %s19_s10 = sshll.u32 %s183_s9, 4  ;;  %s32_s12 = sshll.u32 %s184_s11, 4  ;;  %s20_s10 = int_to_ptr.vmem [resolvable:$true] %s19_s10  ;;  %s33_s12 = int_to_ptr.vmem [resolvable:$true] %s32_s12 }
   0x4   :  { %s111_s15 = scalar_lea.hbm %s237_s0, 128 }
   0x5   :  { %p112_p0 = scmp.ne.s32.totalorder %s237_s0, %s111_s15  ;;  %p115_p1 = scmp.lt.u32.totalorder %s111_s15, %s237_s0 }
   0x7   :  { %p117_p2 = pnand %p115_p1, %p112_p0 }
   0x9   :  { %120 = shalt.err (!%p117_p2)
}
   0xa   :  { %s121_s20 = scalar_lea.vmem %s20_s10, 128  ;;  %p126_p4 = scmp.lt.s32.totalorder %s20_s10, %s20_s10 }
   0xb   :  { %p122_p3 = scmp.ne.s32.totalorder %s20_s10, %s121_s20  ;;  %p127_p5 = scmp.lt.s32.totalorder %s121_s20, %s121_s20 }
   0xd   :  { %p128_p6 = por %p127_p5, %p126_p4 }
   0xf   :  { %p129_p7 = pnand %p128_p6, %p122_p3 }
  0x11   :  { %132 = shalt.err (!%p129_p7)
}
  0x12   :  { %22 = dma.hbm_to_vmem [thread:$0]  %s237_s0, 128, %s20_s10, [#allocation5]  }
  0x13   :  { %s133_s25 = scalar_lea.hbm %s238_s1, 128 }
  0x14   :  { %p134_p8 = scmp.ne.s32.totalorder %s238_s1, %s133_s25  ;;  %p137_p9 = scmp.lt.u32.totalorder %s133_s25, %s238_s1 }
  0x16   :  { %p139_p10 = pnand %p137_p9, %p134_p8 }
  0x18   :  { %142 = shalt.err (!%p139_p10)
}
  0x19   :  { %s143_s30 = scalar_lea.vmem %s33_s12, 128  ;;  %p148_p12 = scmp.lt.s32.totalorder %s33_s12, %s33_s12 }
  0x1a   :  { %p144_p11 = scmp.ne.s32.totalorder %s33_s12, %s143_s30  ;;  %p149_p13 = scmp.lt.s32.totalorder %s143_s30, %s143_s30 }
  0x1c   :  { %p150_p0 = por %p149_p13, %p148_p12 }
  0x1e   :  { %p151_p1 = pnand %p150_p0, %p144_p11 }
  0x20   :  { %154 = shalt.err (!%p151_p1)
}
  0x21   :  { %35 = dma.hbm_to_vmem [thread:$0]  %s238_s1, 128, %s33_s12, [#allocation8]  }
  0x22   :  { %177 = dma.done.wait [#allocation5], 128  }
  0x23   :  { %178 = vsyncadd [#allocation5], 4294967168 }
  0x24   :  { %179 = dma.done.wait [#allocation8], 128  }
  0x25   :  { %180 = vsyncadd [#allocation8], 4294967168  ;;  %v49_v0 = vlaneseq  ;;  %v56_v4 = vld [vmem:[#allocation4] sm:$0xff]  ;;  %v57_v5 = vld [vmem:[#allocation7] sm:$0xff]  ;;  %s185_s1 = smov [#allocation9]  }
  0x26   :  { %v104_v7 = vclamps-f32 %v56_v4, 10.0  ;;  %v105_v8 = vclamps-f32 %v57_v5, 10.0  ;;  %v63_v9 = vsub.f32 %v56_v4, %v57_v5  ;;  %s94_s4 = sshll.u32 %s185_s1, 4  ;;  %s95_s4 = int_to_ptr.vmem [resolvable:$true] %s94_s4 }
  0x27   :  { %v50_v1 = vand.u32 127, %v49_v0  ;;  %s155_s7 = scalar_lea.vmem %s95_s4, 128  ;;  %p160_p3 = scmp.lt.s32.totalorder %s95_s4, %s95_s4 }
  0x28   :  { %v62_v11 = vsub.f32 %v104_v7, %v105_v8  ;;  %v66_v12 = vmul.f32 %v63_v9, %v63_v9  ;;  %p156_p2 = scmp.ne.s32.totalorder %s95_s4, %s155_s7  ;;  %p161_p4 = scmp.lt.s32.totalorder %s155_s7, %s155_s7 }
  0x29   :  { %v51_v2 = vcvt.s32.f32 %v50_v1 }
  0x2a   :  { %v64_v13 = vmul.f32 %v62_v11, %v62_v11  ;;  %p162_p5 = por %p161_p4, %p160_p3 }
  0x2b   :  { %v52_v3 = vmul.f32 0.003937008, %v51_v2 }
  0x2c   :  { %p163_p6 = pnand %p162_p5, %p156_p2 }
  0x2d   :  { %v53_v6 = vadd.f32 1.0, %v52_v3 }
  0x2f   :  { %v54_v10 = vmul.f32 0.5, %v53_v6 }
  0x31   :  { %v67_v14 = vmul.f32 %v66_v12, %v54_v10 }
  0x33   :  { %v68_v15 = vadd.f32 %v67_v14, %v64_v13 }
  0x35   :  { %76 = vadd.xlane.f32.xlu0 %v68_v15 }
  0xc2   :  { %v77_v16 = vpop.xlane.xlu0 %76 }
  0xc3   :  { %v78_v17 = vrot.slane %v77_v16, 4 }
  0xc5   :  { %v79_v18 = vadd.f32 %v78_v17, %v77_v16 }
  0xc7   :  { %v80_v19 = vrot.slane %v79_v18, 2 }
  0xc9   :  { %v81_v20 = vadd.f32 %v80_v19, %v79_v18 }
  0xcb   :  { %v82_v21 = vrot.slane %v81_v20, 1 }
  0xcd   :  { %v83_v22 = vadd.f32 %v82_v21, %v81_v20 }
  0xcf   :  { %106 = vpush %v83_v22 }
 0x100   :  { %s107_s5 = spop %106 }
 0x101   :  { %s85_s6 = smul.f32 0.0009765625, %s107_s5 }
 0x103   :  { %v86_v23 = vstv %s85_s6 }
 0x104   :  { %87 = vst [vmem:[#allocation9] sm:$0xff] %v86_v23 }
 0x105   :  { %166 = shalt.err (!%p163_p6)
}
 0x106   :  { %s167_s10 = scalar_lea.hbm %s239_s2, 128 }
 0x107   :  { %p168_p7 = scmp.ne.s32.totalorder %s239_s2, %s167_s10  ;;  %p171_p8 = scmp.lt.u32.totalorder %s167_s10, %s239_s2 }
 0x109   :  { %p173_p9 = pnand %p171_p8, %p168_p7 }
 0x10b   :  { %176 = shalt.err (!%p173_p9)
}
 0x10c   :  { %97 = dma.vmem_to_hbm [thread:$0]  %s95_s4, 128, %s239_s2, [#allocation6]  }
 0x10d   :  { %181 = dma.done.wait [#allocation6], 128  }
 0x10e   :  { %182 = vsyncadd [#allocation6], 4294967168 }
 0x10f   :  { %101 = vsyncpa [#allocation5], 1 }
 0x110   :  { %102 = vsyncpa [#allocation8], 1 }
 0x111   :  { %103 = vsyncpa [#allocation6], 1 }

</bundles_post_ra>
